<compile_context>
chip_gen: v7x
topology: tpu7x:2x2x1
jax: 0.10.0
libtpu: 0.0.40
codegen_flags: <defaults>
</compile_context>

<pallas_src>
import jax
import jax.numpy as jnp
from jax import lax
from jax.experimental import pallas as pl
from jax.experimental.pallas import tpu as pltpu


def _make_grpo_kernel(*, clip_eps, kl_weight, B, T, bc, tk, adv_per_seq):
    """Kernel closure with static hyperparameters / true (unpadded) shapes."""
    clip_lo = 1.0 - clip_eps
    clip_hi = 1.0 + clip_eps

    def kernel(logp_ref, old_ref, ref_ref, mask_ref, adv_ref,
               num_out, den_out, kl_out,
               num_sc, den_sc, kl_sc):
        # grid = (batch_chunks [parallel], token_tiles [arbitrary])
        b = pl.program_id(0)
        t = pl.program_id(1)

        # Zero the per-row accumulators at the start of every token sweep.
        @pl.when(t == 0)
        def _():
            num_sc[...] = jnp.zeros_like(num_sc)
            den_sc[...] = jnp.zeros_like(den_sc)
            kl_sc[...] = jnp.zeros_like(kl_sc)

        # Validity mask for ragged B / T tails (inputs are NOT padded in HBM;
        # trailing blocks read unspecified data which we zero out here before
        # any arithmetic, so no NaN/Inf can propagate).
        row = lax.broadcasted_iota(jnp.int32, (bc, tk), 0) + b * bc
        col = lax.broadcasted_iota(jnp.int32, (bc, tk), 1) + t * tk
        valid = (row < B) & (col < T)
        zero = jnp.zeros((), jnp.float32)

        # Inputs may arrive as bf16 / bool / int; accumulate in f32.
        lp  = jnp.where(valid, logp_ref[...].astype(jnp.float32), zero)
        old = jnp.where(valid, old_ref[...].astype(jnp.float32), zero)
        lrf = jnp.where(valid, ref_ref[...].astype(jnp.float32), zero)
        m   = jnp.where(valid, mask_ref[...].astype(jnp.float32), zero)

        if adv_per_seq:
            row1 = lax.broadcasted_iota(jnp.int32, (bc, 1), 0) + b * bc
            adv = jnp.where(row1 < B, adv_ref[...].astype(jnp.float32), zero)
        else:
            adv = jnp.where(valid, adv_ref[...].astype(jnp.float32), zero)

        # kl_div (k3 estimator): masked log-ratio, then exp(lr) - lr - 1.
        # Invalid / masked positions have log_ratio == 0 -> kl == 0.
        log_ratio = (lrf - lp) * m
        kl = jnp.exp(log_ratio) - log_ratio - 1.0

        # Clipped surrogate objective (ratio == 1 on invalid positions,
        # adv == 0 there, so elem == 0).
        ratio = jnp.exp(lp - old)
        surr1 = ratio * adv
        surr2 = jnp.clip(ratio, clip_lo, clip_hi) * adv
        elem = -jnp.minimum(surr1, surr2) + kl_weight * kl

        # Per-row partial sums for this token tile (XLU-slot reductions;
        # free filler under the HBM/DMA bottleneck).
        num_sc[...] += jnp.sum(elem * m, axis=-1, keepdims=True)
        den_sc[...] += jnp.sum(m,        axis=-1, keepdims=True)
        kl_sc[...]  += jnp.sum(kl,       axis=-1, keepdims=True)

        # Single (bc, 1) store per batch chunk, at the last token tile.
        @pl.when(t == pl.num_programs(1) - 1)
        def _():
            num_out[...] = num_sc[...]
            den_out[...] = den_sc[...]
            kl_out[...] = kl_sc[...]

    return kernel


def grpo_loss(log_probs, old_log_probs, log_probs_ref, action_mask, advantages,
              *, clip_eps: float, kl_weight: float,
              block_b: int = 128, block_t: int = 2048):
    """Computes (loss, kl_mean) exactly like GRPOLoss.forward (post log-prob step)."""
    B, T = log_probs.shape

    # Per-sequence advantages ((B,) or (B,1)) are streamed as a (bc, 1) block.
    adv = advantages
    if adv.ndim == 1:
        adv = adv[:, None]
    adv_per_seq = (adv.shape[-1] == 1) and (T != 1)

    # Token tile: lane-dense multiple of 128, unless it covers the full T.
    tk = min(block_t, pl.cdiv(T, 128) * 128)
    if tk != T:
        tk = max(128, (tk // 128) * 128)

    # Batch tile: multiple of 8 sublanes, unless it covers the full batch.
    if B <= block_b:
        bc = B
    else:
        bc = max(8, (block_b // 8) * 8)
    # v7x megacore: keep >= 2 batch chunks so the "parallel" axis feeds both
    # TensorCores whenever the batch is large enough to split legally.
    if B > 8 and pl.cdiv(B, bc) < 2:
        half = ((pl.cdiv(B, 2) + 7) // 8) * 8
        if half < B:
            bc = half

    grid = (pl.cdiv(B, bc), pl.cdiv(T, tk))
    b_out = grid[0] * bc

    tok_spec = pl.BlockSpec((bc, tk), lambda b, t: (b, t))
    adv_spec = (pl.BlockSpec((bc, 1), lambda b, t: (b, 0))
                if adv_per_seq else tok_spec)
    out_spec = pl.BlockSpec((bc, 1), lambda b, t: (b, 0))

    # VMEM budget (double-buffered input blocks) + explicit limit with headroom;
    # defaults (bc<=128, tk=2048, f32) stay well inside v5e/v6e/v7x ceilings.
    per_step = 2 * bc * tk * sum(
        x.dtype.itemsize for x in (log_probs, old_log_probs, log_probs_ref,
                                   action_mask))
    per_step += 2 * bc * (1 if adv_per_seq else tk) * adv.dtype.itemsize
    vmem_limit = int(min(max(2 * per_step + (4 << 20), 16 << 20), 64 << 20))

    in_bytes = sum(int(x.size) * x.dtype.itemsize
                   for x in (log_probs, old_log_probs, log_probs_ref,
                             action_mask, adv))
    cost = pl.CostEstimate(flops=12 * B * T,
                           transcendentals=2 * B * T,
                           bytes_accessed=in_bytes + 3 * b_out * 4)

    num, den, kl_row = pl.pallas_call(
        _make_grpo_kernel(clip_eps=clip_eps, kl_weight=kl_weight,
                          B=B, T=T, bc=bc, tk=tk, adv_per_seq=adv_per_seq),
        out_shape=(
            jax.ShapeDtypeStruct((b_out, 1), jnp.float32),
            jax.ShapeDtypeStruct((b_out, 1), jnp.float32),
            jax.ShapeDtypeStruct((b_out, 1), jnp.float32),
        ),
        grid=grid,
        in_specs=[tok_spec, tok_spec, tok_spec, tok_spec, adv_spec],
        out_specs=(out_spec, out_spec, out_spec),
        scratch_shapes=[pltpu.VMEM((bc, 1), jnp.float32),
                        pltpu.VMEM((bc, 1), jnp.float32),
                        pltpu.VMEM((bc, 1), jnp.float32)],
        compiler_params=pltpu.CompilerParams(
            dimension_semantics=("parallel", "arbitrary"),
            vmem_limit_bytes=vmem_limit),
        cost_estimate=cost,
    )(log_probs, old_log_probs, log_probs_ref, action_mask, adv)

    # Final tiny reductions outside the kernel (touches only O(B) scalars).
    num = num[:B, 0]
    den = den[:B, 0]
    kl_row = kl_row[:B, 0]
    loss = jnp.mean(num / den)            # masked_mean over T, then mean over B
    kl_mean = jnp.sum(kl_row) / (B * T)   # kl.mean() over the true B*T elements
    return loss, kl_mean


def _reference(log_probs, old_log_probs, log_probs_ref, action_mask, advantages,
               clip_eps, kl_weight):
    adv = advantages if advantages.ndim == 2 else advantages[:, None]
    lr = (log_probs_ref - log_probs) * action_mask
    kl = jnp.exp(lr) - lr - 1.0
    ratio = jnp.exp(log_probs - old_log_probs)
    surr1 = ratio * adv
    surr2 = jnp.clip(ratio, 1 - clip_eps, 1 + clip_eps) * adv
    loss = -jnp.minimum(surr1, surr2) + kl_weight * kl
    loss = jnp.mean(jnp.sum(loss * action_mask, -1) / jnp.sum(action_mask, -1))
    return loss, jnp.mean(kl)


if __name__ == "__main__":
    clip_eps, kl_weight = 0.2, 0.04    # GRPOLoss.__init__ hyperparameters

    # --- test 1: small, aligned, per-token advantages -----------------------
    B, T = 4, 128
    key = jax.random.PRNGKey(0)
    k1, k2, k3, k4, k5 = jax.random.split(key, 5)
    log_probs     = -jnp.abs(jax.random.normal(k1, (B, T), jnp.float32))
    old_log_probs = -jnp.abs(jax.random.normal(k2, (B, T), jnp.float32))
    log_probs_ref = -jnp.abs(jax.random.normal(k3, (B, T), jnp.float32))
    action_mask   = (jax.random.uniform(k4, (B, T)) > 0.25).astype(jnp.float32)
    advantages    = jax.random.normal(k5, (B, T), jnp.float32)

    loss, kl_mean = grpo_loss(
        log_probs, old_log_probs, log_probs_ref, action_mask, advantages,
        clip_eps=clip_eps, kl_weight=kl_weight)
    jax.block_until_ready((loss, kl_mean))
    ref_loss, ref_kl = _reference(log_probs, old_log_probs, log_probs_ref,
                                  action_mask, advantages, clip_eps, kl_weight)
    assert jnp.allclose(loss, ref_loss, rtol=1e-5, atol=1e-5), (loss, ref_loss)
    assert jnp.allclose(kl_mean, ref_kl, rtol=1e-5, atol=1e-5), (kl_mean, ref_kl)

    # --- test 2: ragged B/T tails + per-sequence advantages -----------------
    B2, T2 = 5, 200
    k6, k7, k8, k9, k10 = jax.random.split(jax.random.PRNGKey(1), 5)
    lp2  = -jnp.abs(jax.random.normal(k6, (B2, T2), jnp.float32))
    old2 = -jnp.abs(jax.random.normal(k7, (B2, T2), jnp.float32))
    lrf2 = -jnp.abs(jax.random.normal(k8, (B2, T2), jnp.float32))
    m2 = (jax.random.uniform(k9, (B2, T2)) > 0.3).astype(jnp.float32)
    m2 = m2.at[:, 0].set(1.0)                      # guard against all-zero rows
    adv2 = jax.random.normal(k10, (B2, 1), jnp.float32)

    loss2, kl2 = grpo_loss(lp2, old2, lrf2, m2, adv2,
                           clip_eps=clip_eps, kl_weight=kl_weight)
    jax.block_until_ready((loss2, kl2))
    rloss2, rkl2 = _reference(lp2, old2, lrf2, m2, adv2, clip_eps, kl_weight)
    assert jnp.allclose(loss2, rloss2, rtol=1e-5, atol=1e-5), (loss2, rloss2)
    assert jnp.allclose(kl2, rkl2, rtol=1e-5, atol=1e-5), (kl2, rkl2)

    print("KERNEL_OK")
</pallas_src>

<mosaic_0001>
module attributes {stable_mosaic.version = 11 : i64} {
  func.func @kernel(%arg0: i32, %arg1: i32, %arg2: memref<4x128xf32, #tpu.memory_space<vmem>>, %arg3: memref<4x128xf32, #tpu.memory_space<vmem>>, %arg4: memref<4x128xf32, #tpu.memory_space<vmem>>, %arg5: memref<4x128xf32, #tpu.memory_space<vmem>>, %arg6: memref<4x128xf32, #tpu.memory_space<vmem>>, %arg7: memref<4x1xf32, #tpu.memory_space<vmem>>, %arg8: memref<4x1xf32, #tpu.memory_space<vmem>>, %arg9: memref<4x1xf32, #tpu.memory_space<vmem>>, %arg10: memref<4x1xf32, #tpu.memory_space<vmem>>, %arg11: memref<4x1xf32, #tpu.memory_space<vmem>>, %arg12: memref<4x1xf32, #tpu.memory_space<vmem>>) attributes {dimension_semantics = [#tpu.dimension_semantics<parallel>, #tpu.dimension_semantics<arbitrary>], iteration_bounds = array<i64: 1, 1>, scalar_prefetch = 0 : i64, scratch_operands = 3 : i64, tpu.core_type = #tpu.core_type<tc>, window_params = [{transform_indices = @transform_0, window_bounds = array<i64: 4, 128>}, {transform_indices = @transform_1, window_bounds = array<i64: 4, 128>}, {transform_indices = @transform_2, window_bounds = array<i64: 4, 128>}, {transform_indices = @transform_3, window_bounds = array<i64: 4, 128>}, {transform_indices = @transform_4, window_bounds = array<i64: 4, 128>}, {transform_indices = @transform_5, window_bounds = array<i64: 4, 1>}, {transform_indices = @transform_6, window_bounds = array<i64: 4, 1>}, {transform_indices = @transform_7, window_bounds = array<i64: 4, 1>}]} {
    %c0_i32 = arith.constant 0 : i32
    %0 = arith.cmpi eq, %arg1, %c0_i32 : i32
    %1 = arith.extui %0 : i1 to i32
    %c0_i32_0 = arith.constant 0 : i32
    %2 = arith.cmpi ne, %1, %c0_i32_0 : i32
    scf.if %2 {
      %cst_38 = arith.constant 0.000000e+00 : f32
      %70 = vector.broadcast %cst_38 : f32 to vector<4x1xf32>
      %c0_39 = arith.constant 0 : index
      %c0_40 = arith.constant 0 : index
      %71 = vector.load %arg10[%c0_39, %c0_40] : memref<4x1xf32, #tpu.memory_space<vmem>>, vector<4x1xf32>
      tpu.vector_store %arg10[%c0_39, %c0_40], %70 {strides = array<i32>} : memref<4x1xf32, #tpu.memory_space<vmem>>, vector<4x1xf32>,
      %cst_41 = arith.constant 0.000000e+00 : f32
      %72 = vector.broadcast %cst_41 : f32 to vector<4x1xf32>
      %c0_42 = arith.constant 0 : index
      %c0_43 = arith.constant 0 : index
      %73 = vector.load %arg11[%c0_42, %c0_43] : memref<4x1xf32, #tpu.memory_space<vmem>>, vector<4x1xf32>
      tpu.vector_store %arg11[%c0_42, %c0_43], %72 {strides = array<i32>} : memref<4x1xf32, #tpu.memory_space<vmem>>, vector<4x1xf32>,
      %cst_44 = arith.constant 0.000000e+00 : f32
      %74 = vector.broadcast %cst_44 : f32 to vector<4x1xf32>
      %c0_45 = arith.constant 0 : index
      %c0_46 = arith.constant 0 : index
      %75 = vector.load %arg12[%c0_45, %c0_46] : memref<4x1xf32, #tpu.memory_space<vmem>>, vector<4x1xf32>
      tpu.vector_store %arg12[%c0_45, %c0_46], %74 {strides = array<i32>} : memref<4x1xf32, #tpu.memory_space<vmem>>, vector<4x1xf32>,
    } else {
    }
    %3 = tpu.iota {dimensions = array<i32: 0>} : vector<4x128xi32>
    %c4_i32 = arith.constant 4 : i32
    %4 = arith.muli %arg0, %c4_i32 : i32
    %5 = vector.broadcast %4 : i32 to vector<4x128xi32>
    %6 = arith.addi %3, %5 : vector<4x128xi32>
    %7 = tpu.iota {dimensions = array<i32: 1>} : vector<4x128xi32>
    %c128_i32 = arith.constant 128 : i32
    %8 = arith.muli %arg1, %c128_i32 : i32
    %9 = vector.broadcast %8 : i32 to vector<4x128xi32>
    %10 = arith.addi %7, %9 : vector<4x128xi32>
    %c4_i32_1 = arith.constant 4 : i32
    %11 = vector.broadcast %c4_i32_1 : i32 to vector<4x128xi32>
    %12 = arith.cmpi slt, %6, %11 : vector<4x128xi32>
    %c128_i32_2 = arith.constant 128 : i32
    %13 = vector.broadcast %c128_i32_2 : i32 to vector<4x128xi32>
    %14 = arith.cmpi slt, %10, %13 : vector<4x128xi32>
    %15 = arith.andi %12, %14 : vector<4x128xi1>
    %c0 = arith.constant 0 : index
    %c0_3 = arith.constant 0 : index
    %16 = vector.load %arg2[%c0, %c0_3] : memref<4x128xf32, #tpu.memory_space<vmem>>, vector<4x128xf32>
    %cst = arith.constant 0.000000e+00 : f32
    %17 = vector.broadcast %cst : f32 to vector<4x128xf32>
    %18 = arith.select %15, %16, %17 : vector<4x128xi1>, vector<4x128xf32>
    %c0_4 = arith.constant 0 : index
    %c0_5 = arith.constant 0 : index
    %19 = vector.load %arg3[%c0_4, %c0_5] : memref<4x128xf32, #tpu.memory_space<vmem>>, vector<4x128xf32>
    %cst_6 = arith.constant 0.000000e+00 : f32
    %20 = vector.broadcast %cst_6 : f32 to vector<4x128xf32>
    %21 = arith.select %15, %19, %20 : vector<4x128xi1>, vector<4x128xf32>
    %c0_7 = arith.constant 0 : index
    %c0_8 = arith.constant 0 : index
    %22 = vector.load %arg4[%c0_7, %c0_8] : memref<4x128xf32, #tpu.memory_space<vmem>>, vector<4x128xf32>
    %cst_9 = arith.constant 0.000000e+00 : f32
    %23 = vector.broadcast %cst_9 : f32 to vector<4x128xf32>
    %24 = arith.select %15, %22, %23 : vector<4x128xi1>, vector<4x128xf32>
    %c0_10 = arith.constant 0 : index
    %c0_11 = arith.constant 0 : index
    %25 = vector.load %arg5[%c0_10, %c0_11] : memref<4x128xf32, #tpu.memory_space<vmem>>, vector<4x128xf32>
    %cst_12 = arith.constant 0.000000e+00 : f32
    %26 = vector.broadcast %cst_12 : f32 to vector<4x128xf32>
    %27 = arith.select %15, %25, %26 : vector<4x128xi1>, vector<4x128xf32>
    %c0_13 = arith.constant 0 : index
    %c0_14 = arith.constant 0 : index
    %28 = vector.load %arg6[%c0_13, %c0_14] : memref<4x128xf32, #tpu.memory_space<vmem>>, vector<4x128xf32>
    %cst_15 = arith.constant 0.000000e+00 : f32
    %29 = vector.broadcast %cst_15 : f32 to vector<4x128xf32>
    %30 = arith.select %15, %28, %29 : vector<4x128xi1>, vector<4x128xf32>
    %31 = arith.subf %24, %18 : vector<4x128xf32>
    %32 = arith.mulf %31, %27 : vector<4x128xf32>
    %33 = math.exp %32 : vector<4x128xf32>
    %34 = arith.subf %33, %32 : vector<4x128xf32>
    %cst_16 = arith.constant 1.000000e+00 : f32
    %35 = vector.broadcast %cst_16 : f32 to vector<4x128xf32>
    %36 = arith.subf %34, %35 : vector<4x128xf32>
    %37 = arith.subf %18, %21 : vector<4x128xf32>
    %38 = math.exp %37 : vector<4x128xf32>
    %39 = arith.mulf %38, %30 : vector<4x128xf32>
    %cst_17 = arith.constant 8.000000e-01 : f32
    %cst_18 = arith.constant 1.200000e+00 : f32
    %40 = vector.broadcast %cst_17 : f32 to vector<4x128xf32>
    %41 = arith.maximumf %40, %38 : vector<4x128xf32>
    %42 = vector.broadcast %cst_18 : f32 to vector<4x128xf32>
    %43 = arith.minimumf %42, %41 : vector<4x128xf32>
    %44 = arith.mulf %43, %30 : vector<4x128xf32>
    %45 = arith.minimumf %39, %44 : vector<4x128xf32>
    %cst_19 = arith.constant 0.000000e+00 : f32
    %46 = vector.broadcast %cst_19 : f32 to vector<4x128xf32>
    %47 = arith.subf %46, %45 : vector<4x128xf32>
    %cst_20 = arith.constant 4.000000e-02 : f32
    %48 = vector.broadcast %cst_20 : f32 to vector<4x128xf32>
    %49 = arith.mulf %48, %36 : vector<4x128xf32>
    %50 = arith.addf %47, %49 : vector<4x128xf32>
    %c0_21 = arith.constant 0 : index
    %c0_22 = arith.constant 0 : index
    %51 = vector.load %arg10[%c0_21, %c0_22] : memref<4x1xf32, #tpu.memory_space<vmem>>, vector<4x1xf32>
    %52 = arith.mulf %50, %27 : vector<4x128xf32>
    %cst_23 = arith.constant dense<0.000000e+00> : vector<4xf32>
    %53 = vector.multi_reduction <add>, %52, %cst_23 [1] : vector<4x128xf32> to vector<4xf32>
    %54 = vector.shape_cast %53 : vector<4xf32> to vector<4x1xf32>
    %55 = arith.addf %51, %54 : vector<4x1xf32>
    %c0_24 = arith.constant 0 : index
    %c0_25 = arith.constant 0 : index
    %56 = vector.load %arg10[%c0_24, %c0_25] : memref<4x1xf32, #tpu.memory_space<vmem>>, vector<4x1xf32>
    tpu.vector_store %arg10[%c0_24, %c0_25], %55 {strides = array<i32>} : memref<4x1xf32, #tpu.memory_space<vmem>>, vector<4x1xf32>,
    %c0_26 = arith.constant 0 : index
    %c0_27 = arith.constant 0 : index
    %57 = vector.load %arg11[%c0_26, %c0_27] : memref<4x1xf32, #tpu.memory_space<vmem>>, vector<4x1xf32>
    %cst_28 = arith.constant dense<0.000000e+00> : vector<4xf32>
    %58 = vector.multi_reduction <add>, %27, %cst_28 [1] : vector<4x128xf32> to vector<4xf32>
    %59 = vector.shape_cast %58 : vector<4xf32> to vector<4x1xf32>
    %60 = arith.addf %57, %59 : vector<4x1xf32>
    %c0_29 = arith.constant 0 : index
    %c0_30 = arith.constant 0 : index
    %61 = vector.load %arg11[%c0_29, %c0_30] : memref<4x1xf32, #tpu.memory_space<vmem>>, vector<4x1xf32>
    tpu.vector_store %arg11[%c0_29, %c0_30], %60 {strides = array<i32>} : memref<4x1xf32, #tpu.memory_space<vmem>>, vector<4x1xf32>,
    %c0_31 = arith.constant 0 : index
    %c0_32 = arith.constant 0 : index
    %62 = vector.load %arg12[%c0_31, %c0_32] : memref<4x1xf32, #tpu.memory_space<vmem>>, vector<4x1xf32>
    %cst_33 = arith.constant dense<0.000000e+00> : vector<4xf32>
    %63 = vector.multi_reduction <add>, %36, %cst_33 [1] : vector<4x128xf32> to vector<4xf32>
    %64 = vector.shape_cast %63 : vector<4xf32> to vector<4x1xf32>
    %65 = arith.addf %62, %64 : vector<4x1xf32>
    %c0_34 = arith.constant 0 : index
    %c0_35 = arith.constant 0 : index
    %66 = vector.load %arg12[%c0_34, %c0_35] : memref<4x1xf32, #tpu.memory_space<vmem>>, vector<4x1xf32>
    tpu.vector_store %arg12[%c0_34, %c0_35], %65 {strides = array<i32>} : memref<4x1xf32, #tpu.memory_space<vmem>>, vector<4x1xf32>,
    %c0_i32_36 = arith.constant 0 : i32
    %67 = arith.cmpi eq, %arg1, %c0_i32_36 : i32
    %68 = arith.extui %67 : i1 to i32
    %c0_i32_37 = arith.constant 0 : i32
    %69 = arith.cmpi ne, %68, %c0_i32_37 : i32
    scf.if %69 {
      %c0_38 = arith.constant 0 : index
      %c0_39 = arith.constant 0 : index
      %70 = vector.load %arg10[%c0_38, %c0_39] : memref<4x1xf32, #tpu.memory_space<vmem>>, vector<4x1xf32>
      %c0_40 = arith.constant 0 : index
      %c0_41 = arith.constant 0 : index
      %71 = vector.load %arg7[%c0_40, %c0_41] : memref<4x1xf32, #tpu.memory_space<vmem>>, vector<4x1xf32>
      tpu.vector_store %arg7[%c0_40, %c0_41], %70 {strides = array<i32>} : memref<4x1xf32, #tpu.memory_space<vmem>>, vector<4x1xf32>,
      %c0_42 = arith.constant 0 : index
      %c0_43 = arith.constant 0 : index
      %72 = vector.load %arg11[%c0_42, %c0_43] : memref<4x1xf32, #tpu.memory_space<vmem>>, vector<4x1xf32>
      %c0_44 = arith.constant 0 : index
      %c0_45 = arith.constant 0 : index
      %73 = vector.load %arg8[%c0_44, %c0_45] : memref<4x1xf32, #tpu.memory_space<vmem>>, vector<4x1xf32>
      tpu.vector_store %arg8[%c0_44, %c0_45], %72 {strides = array<i32>} : memref<4x1xf32, #tpu.memory_space<vmem>>, vector<4x1xf32>,
      %c0_46 = arith.constant 0 : index
      %c0_47 = arith.constant 0 : index
      %74 = vector.load %arg12[%c0_46, %c0_47] : memref<4x1xf32, #tpu.memory_space<vmem>>, vector<4x1xf32>
      %c0_48 = arith.constant 0 : index
      %c0_49 = arith.constant 0 : index
      %75 = vector.load %arg9[%c0_48, %c0_49] : memref<4x1xf32, #tpu.memory_space<vmem>>, vector<4x1xf32>
      tpu.vector_store %arg9[%c0_48, %c0_49], %74 {strides = array<i32>} : memref<4x1xf32, #tpu.memory_space<vmem>>, vector<4x1xf32>,
    } else {
    }
    return
  }
  func.func @transform_0(%arg0: i32, %arg1: i32) -> (i32, i32) {
    %c0_i32 = arith.constant 0 : i32
    return %arg0, %arg1 : i32, i32
  }
  func.func @transform_1(%arg0: i32, %arg1: i32) -> (i32, i32) {
    %c0_i32 = arith.constant 0 : i32
    return %arg0, %arg1 : i32, i32
  }
  func.func @transform_2(%arg0: i32, %arg1: i32) -> (i32, i32) {
    %c0_i32 = arith.constant 0 : i32
    return %arg0, %arg1 : i32, i32
  }
  func.func @transform_3(%arg0: i32, %arg1: i32) -> (i32, i32) {
    %c0_i32 = arith.constant 0 : i32
    return %arg0, %arg1 : i32, i32
  }
  func.func @transform_4(%arg0: i32, %arg1: i32) -> (i32, i32) {
    %c0_i32 = arith.constant 0 : i32
    return %arg0, %arg1 : i32, i32
  }
  func.func @transform_5(%arg0: i32, %arg1: i32) -> (i32, i32) {
    %c0_i32 = arith.constant 0 : i32
    %c0_i32_0 = arith.constant 0 : i32
    return %arg0, %c0_i32 : i32, i32
  }
  func.func @transform_6(%arg0: i32, %arg1: i32) -> (i32, i32) {
    %c0_i32 = arith.constant 0 : i32
    %c0_i32_0 = arith.constant 0 : i32
    return %arg0, %c0_i32 : i32, i32
  }
  func.func @transform_7(%arg0: i32, %arg1: i32) -> (i32, i32) {
    %c0_i32 = arith.constant 0 : i32
    %c0_i32_0 = arith.constant 0 : i32
    return %arg0, %c0_i32 : i32, i32
  }
}

</mosaic_0001>

<bundles_post_ra>
// kernel: tpu_custom_call.1
= control target key start
LH: loop header
LB: loop body
LE: loop exit
PB: predicated region body
PF: predicated region fallthrough
CT: control target
= control target key end

     0   :  { %13 = vsyncpa [#allocation6], 0  ;;  %s294_s0 = inlined_call_operand.hbm [shape: f32[4,128], index: 0, kind: input, shape index: {}]   ;;  %s295_s1 = inlined_call_operand.hbm [shape: f32[4,128], index: 1, kind: input, shape index: {}]   ;;  %s296_s2 = inlined_call_operand.vmem [shape: f32[4,128], index: 2, kind: input, shape index: {}]   ;;  %s297_s3 = inlined_call_operand.vmem [shape: f32[4,128], index: 3, kind: input, shape index: {}]   ;;  %s298_s4 = inlined_call_operand.vmem [shape: f32[4,128], index: 4, kind: input, shape index: {}]   ;;  %s299_s5 = inlined_call_operand.vmem [shape: f32[4,1], index: 5, kind: output, shape index: {0}]   ;;  %s300_s6 = inlined_call_operand.vmem [shape: f32[4,1], index: 6, kind: output, shape index: {1}]   ;;  %s301_s7 = inlined_call_operand.vmem [shape: f32[4,1], index: 7, kind: output, shape index: {2}]  }
   0x1   :  { %14 = vsyncpa [#allocation8], 0  ;;  %s195_s24 = smov [#allocation5]   ;;  %s196_s26 = smov [#allocation7]  }
   0x2   :  { %s21_s25 = sshll.u32 %s195_s24, 4  ;;  %s31_s27 = sshll.u32 %s196_s26, 4  ;;  %s22_s25 = int_to_ptr.vmem [resolvable:$true] %s21_s25  ;;  %s32_s27 = int_to_ptr.vmem [resolvable:$true] %s31_s27 }
   0x3   :  { %s147_s30 = scalar_lea.hbm %s294_s0, 64 }
   0x4   :  { %p148_p0 = scmp.ne.s32.totalorder %s294_s0, %s147_s30  ;;  %p151_p1 = scmp.lt.u32.totalorder %s147_s30, %s294_s0 }
   0x6   :  { %p153_p2 = pnand %p151_p1, %p148_p0 }
   0x8   :  { %156 = shalt.err (!%p153_p2)
}
   0x9   :  { %s157_s12 = scalar_lea.vmem %s22_s25, 64  ;;  %p162_p4 = scmp.lt.s32.totalorder %s22_s25, %s22_s25 }
   0xa   :  { %p158_p3 = scmp.ne.s32.totalorder %s22_s25, %s157_s12  ;;  %p163_p5 = scmp.lt.s32.totalorder %s157_s12, %s157_s12 }
   0xc   :  { %p164_p6 = por %p163_p5, %p162_p4 }
   0xe   :  { %p165_p7 = pnand %p164_p6, %p158_p3 }
  0x10   :  { %168 = shalt.err (!%p165_p7)
}
  0x11   :  { %24 = dma.hbm_to_vmem [thread:$0]  %s294_s0, 64, %s22_s25, [#allocation6]  }
  0x12   :  { %s169_s17 = scalar_lea.hbm %s295_s1, 64 }
  0x13   :  { %p170_p8 = scmp.ne.s32.totalorder %s295_s1, %s169_s17  ;;  %p173_p9 = scmp.lt.u32.totalorder %s169_s17, %s295_s1 }
  0x15   :  { %p175_p10 = pnand %p173_p9, %p170_p8 }
  0x17   :  { %178 = shalt.err (!%p175_p10)
}
  0x18   :  { %s179_s22 = scalar_lea.vmem %s32_s27, 64  ;;  %p184_p12 = scmp.lt.s32.totalorder %s32_s27, %s32_s27 }
  0x19   :  { %p180_p11 = scmp.ne.s32.totalorder %s32_s27, %s179_s22  ;;  %p185_p13 = scmp.lt.s32.totalorder %s179_s22, %s179_s22 }
  0x1b   :  { %p186_p0 = por %p185_p13, %p184_p12 }
  0x1d   :  { %p187_p1 = pnand %p186_p0, %p180_p11 }
  0x1f   :  { %190 = shalt.err (!%p187_p1)
}
  0x20   :  { %34 = dma.hbm_to_vmem [thread:$0]  %s295_s1, 64, %s32_s27, [#allocation8]  }
  0x21   :  { %191 = dma.done.wait [#allocation6], 64  }
  0x22   :  { %192 = vsyncadd [#allocation6], 4294967232 }
  0x23   :  { %193 = dma.done.wait [#allocation8], 64  }
  0x24   :  { %194 = vsyncadd [#allocation8], 4294967232  ;;  %v55_v0 = vlaneseq  ;;  %vm51_vm0 = vcmask 3072   ;;  %v197_v1 = vmov 0.0   ;;  %v68_v3 = vld [vmem:[#allocation5] sm:$0xf] }
  0x25   :  { %52 = vst.msk [vmem:[#allocation2] sm:$0xf] %vm51_vm0, %v197_v1  ;;  %53 = vst.msk [vmem:[#allocation3] sm:$0xf] %vm51_vm0, %v197_v1  ;;  %v70_v4 = vld [vmem:[#allocation7] sm:$0xf] }
  0x26   :  { %54 = vst.msk [vmem:[#allocation4] sm:$0xf] %vm51_vm0, %v197_v1  ;;  %v56_v2 = vshrl.u32 %v55_v0, 7  ;;  %v72_v5 = vld [vmem:[%s296_s2] sm:$0xf]  ;;  %vm97_vm2 = vcmask 1043456  }
  0x27   :  { %v74_v9 = vld [vmem:[%s297_s3] sm:$0xf] }
  0x28   :  { %vm65_vm1 = vcmp.lt.s32.totalorder %v56_v2, 4  ;;  %v76_v16 = vld [vmem:[%s298_s4] sm:$0xf] }
  0x29   :  { %v69_v6 = vsel %vm65_vm1, %v68_v3, 0.0  ;;  %v71_v7 = vsel %vm65_vm1, %v70_v4, 0.0  ;;  %v73_v8 = vsel %vm65_vm1, %v72_v5, 0.0  ;;  %v75_v10 = vsel %vm65_vm1, %v74_v9, 0.0 }
  0x2a   :  { %v78_v11 = vsub.f32 %v73_v8, %v69_v6  ;;  %v84_v12 = vsub.f32 %v69_v6, %v71_v7  ;;  %v77_v18 = vsel %vm65_vm1, %v76_v16, 0.0  ;;  %v105_v33 = vsel %vm97_vm2, %v75_v10, 0.0 }
  0x2c   :  { %v79_v13 = vmul.f32 %v78_v11, %v75_v10  ;;  %v85_v14 = vmul.f32 1.442695, %v84_v12  ;;  %v95_v37 = vld [vmem:[#allocation2] sm:$0xf]  ;;  %v104_v41 = vld [vmem:[#allocation3] sm:$0xf] }
  0x2d   :  { %v110_v34 = vld [vmem:[#allocation4] sm:$0xf] }
  0x2e   :  { %v80_v15 = vmul.f32 1.442695, %v79_v13  ;;  %143 = vpow2.f32 %v85_v14 }
  0x30   :  { %145 = vpow2.f32 %v80_v15 }
  0x38   :  { %v144_v17 = vpop.eup %143 }
  0x39   :  { %v88_v19 = vmax.f32 %v144_v17, 0.8  ;;  %v87_v22 = vmul.f32 %v144_v17, %v77_v18 }
  0x3a   :  { %v146_v20 = vpop.eup %145 }
  0x3b   :  { %v82_v21 = vsub.f32 %v146_v20, %v79_v13  ;;  %v89_v23 = vmin.f32 %v88_v19, 1.2 }
  0x3d   :  { %v139_v24 = vadd.f32 -1.0, %v82_v21  ;;  %v90_v25 = vmul.f32 %v89_v23, %v77_v18 }
  0x3f   :  { %v91_v26 = vmin.f32 %v87_v22, %v90_v25  ;;  %v93_v27 = vmul.f32 0.04, %v139_v24  ;;  %v111_v28 = vsel %vm97_vm2, %v139_v24, 0.0 }
  0x40   :  { %112 = vadd.xlane.f32.xlu1 %v111_v28 }
  0x41   :  { %v92_v29 = vsub.f32 0.0, %v91_v26 }
  0x43   :  { %v94_v30 = vadd.f32 %v93_v27, %v92_v29 }
  0x45   :  { %v96_v31 = vmul.f32 %v94_v30, %v75_v10 }
  0x47   :  { %v98_v32 = vsel %vm97_vm2, %v96_v31, 0.0 }
  0x48   :  { %99 = vadd.xlane.f32.xlu0 %v98_v32 }
  0x4c   :  { %106 = vadd.xlane.f32.xlu0 %v105_v33 }
  0xcd   :  { %v113_v35 = vpop.xlane.xlu1 %112 }
  0xce   :  { %v114_v36 = vadd.f32 %v113_v35, %v110_v34 }
  0xd0   :  { %115 = vst.msk [vmem:[#allocation4] sm:$0xf] %vm51_vm0, %v114_v36 }
  0xd5   :  { %v100_v38 = vpop.xlane.xlu0 %99 }
  0xd6   :  { %v101_v39 = vadd.f32 %v100_v38, %v95_v37 }
  0xd7   :  { %v123_v40 = vld [vmem:[#allocation4] sm:$0xf] }
  0xd8   :  { %103 = vst.msk [vmem:[#allocation2] sm:$0xf] %vm51_vm0, %v101_v39  ;;  %124 = vst.msk [vmem:[%s301_s7] sm:$0xf] %vm51_vm0, %v123_v40 }
  0xd9   :  { %v107_v42 = vpop.xlane.xlu0 %106 }
  0xda   :  { %v108_v43 = vadd.f32 %v107_v42, %v104_v41 }
  0xdc   :  { %109 = vst.msk [vmem:[#allocation3] sm:$0xf] %vm51_vm0, %v108_v43 }
  0xdf   :  { %v119_v44 = vld [vmem:[#allocation2] sm:$0xf] }
  0xe0   :  { %120 = vst.msk [vmem:[%s299_s5] sm:$0xf] %vm51_vm0, %v119_v44 }
  0xe3   :  { %v121_v45 = vld [vmem:[#allocation3] sm:$0xf] }
  0xe4   :  { %122 = vst.msk [vmem:[%s300_s6] sm:$0xf] %vm51_vm0, %v121_v45 }
  0xe5   :  { %137 = vsyncpa [#allocation6], 1 }
  0xe6   :  { %138 = vsyncpa [#allocation8], 1 }

</bundles_post_ra>
